<compile_context>
chip_gen: v5e
topology: v5e:2x2
jax: 0.10.0
libtpu: 0.0.40
codegen_flags: <defaults>
</compile_context>

<pallas_src>
import jax
import jax.numpy as jnp
from jax.experimental import pallas as pl
from jax.experimental.pallas import tpu as pltpu


# --------------------------------------------------------------------------------------
# Kernels
# --------------------------------------------------------------------------------------
def _scores_kernel(dec_ref, enc_ref, we_ref, v_ref, mask_ref, out_ref):
    """One grid step = (batch tile, sequence tile).

    dec_ref  : [tb, H]       f32            decoder_hide @ W_dec.T + bias (hoisted, S-invariant)
    enc_ref  : [tb, ts, 2H]  f32 (or bf16)  encoder tile (cast to MXU dtype in-kernel)
    we_ref   : [2H, H]       compute dtype  encoder-side weight (resident)
    v_ref    : [1, H]        f32            v projection (resident)
    mask_ref : [tb, ts]      int32          attention mask tile
    out_ref  : [tb, ts]      f32            masked scores
    """
    tb, ts, two_h = enc_ref.shape
    hid = dec_ref.shape[-1]

    enc = enc_ref[...].astype(we_ref.dtype)                        # VPU cast, hidden under DMA
    we_b = jnp.broadcast_to(we_ref[...][None, :, :], (tb, two_h, hid))
    ee = jnp.einsum("bsf,bfh->bsh", enc, we_b,
                    preferred_element_type=jnp.float32)            # MXU, f32 accumulate
    energy = jnp.tanh(ee + dec_ref[...][:, None, :])               # [tb, ts, H] f32 (EUP)
    # v-projection kept on VPU + XLU lane reduce; MXU-hostile N=1 matmul avoided on purpose.
    score = jnp.sum(energy * v_ref[...][None, :, :], axis=-1)      # [tb, ts] f32
    out_ref[...] = jnp.where(mask_ref[...] == 0, jnp.float32(-100000.0), score)


def _softmax_kernel(x_ref, o_ref):
    """Row softmax over the full sequence for one batch tile. Exact division (rows sum to 1)."""
    x = x_ref[...]                                                 # [tb, S] f32
    m = jnp.max(x, axis=-1, keepdims=True)
    e = jnp.exp(x - m)
    o_ref[...] = e / jnp.sum(e, axis=-1, keepdims=True)


# --------------------------------------------------------------------------------------
# Tiling heuristics (no padding anywhere; ragged edges become partial boundary blocks)
# --------------------------------------------------------------------------------------
def _choose_batch_tile(B, S, E):
    if B <= 8:
        return B
    tb = 8
    # Grow the batch tile (multiples of 8) while the per-step encoder block stays small,
    # so tiny-S workloads still move >= ~1-2 MiB per grid step.
    while tb * 2 <= B and tb < 128 and tb * min(S, 2048) * E * 4 < (2 << 20):
        tb *= 2
    return tb


def _choose_seq_tile(S, E, tb, enc_itemsize, seq_tile):
    if S <= 128:
        return S                                   # single tile, block dims == array dims
    max_ts = (S // 128) * 128                      # largest multiple of 128 that is <= S
    if seq_tile is not None:
        if seq_tile >= S:
            return S
        return int(min(max(128, (int(seq_tile) // 128) * 128), max_ts))
    bytes_per_pos = tb * E * enc_itemsize
    cap = (4 << 20) // bytes_per_pos               # positions per ~4 MiB encoder block
    if S <= max(cap, 256):
        return S                                   # single sequence tile
    return int(min(max(128, (cap // 128) * 128), 2048, max_ts))


# --------------------------------------------------------------------------------------
# Wrapper
# --------------------------------------------------------------------------------------
def attention_pallas(decoder_hide, encoder_out, mask, attn_w, attn_b, v_w,
                     *, compute_dtype=jnp.bfloat16, seq_tile=None):
    """decoder_hide [B,H], encoder_out [B,S,2H], mask [B,S] (int/bool),
    attn_w [H,3H], attn_b [H] (PyTorch Linear layout), v_w [1,H].
    Returns softmax attention weights [B,S] f32."""
    B, S, E = encoder_out.shape
    H = decoder_hide.shape[-1]
    assert E == 2 * H and attn_w.shape == (H, 3 * H) and v_w.shape == (1, H)

    # ---- hoist the S-invariant decoder projection (+ bias) out of the kernel (tiny [B, H]) ----
    w_dec = jnp.transpose(attn_w[:, :H]).astype(jnp.float32)              # [H, H]
    dec_proj = decoder_hide.astype(jnp.float32) @ w_dec + attn_b.astype(jnp.float32)[None, :]
    w_enc = jnp.transpose(attn_w[:, H:]).astype(compute_dtype)            # [2H, H]
    v_row = v_w.reshape(1, H).astype(jnp.float32)
    mask_i = mask if mask.dtype == jnp.int32 else mask.astype(jnp.int32)

    # ---- tiling ----
    enc_itemsize = jnp.dtype(encoder_out.dtype).itemsize
    tb = _choose_batch_tile(B, S, E)
    ts = _choose_seq_tile(S, E, tb, enc_itemsize, seq_tile)
    nb = pl.cdiv(B, tb)
    ns = pl.cdiv(S, ts)

    # right-sized VMEM limit (never requests the full physical VMEM of any generation)
    tmp_f32 = tb * ts * 4
    vmem_need = (2 * tb * ts * E * enc_itemsize                           # enc tile, double-buffered
                 + tb * ts * E * jnp.dtype(compute_dtype).itemsize        # in-kernel cast copy
                 + 3 * H * tmp_f32                                        # ee / energy / energy*v
                 + 8 * tmp_f32                                            # mask + score tiles
                 + (1 << 20))                                             # weights, dec_proj, slack
    vmem_limit = int(min(max(2 * vmem_need, 16 << 20), 48 << 20))

    scores = pl.pallas_call(
        _scores_kernel,
        out_shape=jax.ShapeDtypeStruct((B, S), jnp.float32),
        grid=(nb, ns),
        in_specs=[
            pl.BlockSpec((tb, H), lambda b, s: (b, 0)),           # dec_proj (per batch tile)
            pl.BlockSpec((tb, ts, E), lambda b, s: (b, s, 0)),    # encoder tile (pipelined)
            pl.BlockSpec((E, H), lambda b, s: (0, 0)),            # encoder-side weight (resident)
            pl.BlockSpec((1, H), lambda b, s: (0, 0)),            # v (resident)
            pl.BlockSpec((tb, ts), lambda b, s: (b, s)),          # mask tile
        ],
        out_specs=pl.BlockSpec((tb, ts), lambda b, s: (b, s)),    # lane-dense masked scores
        compiler_params=pltpu.CompilerParams(
            dimension_semantics=("parallel", "parallel"),
            vmem_limit_bytes=vmem_limit,
        ),
    )(dec_proj, encoder_out, w_enc, v_row, mask_i)

    # ---- per-row softmax over the full sequence (exact division -> rows sum to 1) ----
    tb2 = min(B, 8)
    nb2 = pl.cdiv(B, tb2)
    vmem_need2 = 8 * tb2 * S * 4 + (1 << 20)
    vmem_limit2 = int(min(max(2 * vmem_need2, 16 << 20), 48 << 20))
    # TODO(synk): for very long sequences (tb2*S*4 >> a few MiB) this single-block row softmax
    # should become a two-pass / online-softmax kernel.
    out = pl.pallas_call(
        _softmax_kernel,
        out_shape=jax.ShapeDtypeStruct((B, S), jnp.float32),
        grid=(nb2,),
        in_specs=[pl.BlockSpec((tb2, S), lambda b: (b, 0))],
        out_specs=pl.BlockSpec((tb2, S), lambda b: (b, 0)),
        compiler_params=pltpu.CompilerParams(
            dimension_semantics=("parallel",),
            vmem_limit_bytes=vmem_limit2,
        ),
    )(scores)
    return out


# --------------------------------------------------------------------------------------
# Pure-JAX reference mirroring the PyTorch forward
# --------------------------------------------------------------------------------------
def attention_ref(decoder_hide, encoder_out, mask, attn_w, attn_b, v_w):
    B, S, _ = encoder_out.shape
    h = jnp.repeat(decoder_hide[:, None, :], S, axis=1)                   # [B, S, H]
    x = jnp.concatenate([h, encoder_out], axis=2)                         # [B, S, 3H]
    energy = jnp.tanh(jnp.einsum("bsf,hf->bsh", x, attn_w) + attn_b)      # [B, S, H]
    attention = jnp.einsum("bsh,oh->bso", energy, v_w)[..., 0]            # [B, S]
    attention = jnp.where(mask == 0, -100000.0, attention)
    return jax.nn.softmax(attention, axis=1)


def _make_inputs(key, B, S, H):
    k_dec, k_enc, k_w, k_b, k_v, k_len = jax.random.split(key, 6)
    decoder_hide = jax.random.normal(k_dec, (B, H), dtype=jnp.float32)
    encoder_out = jax.random.normal(k_enc, (B, S, 2 * H), dtype=jnp.float32)
    lens = jax.random.randint(k_len, (B, 1), 1, S + 1)                    # >=1 valid step per row
    mask = (jnp.arange(S)[None, :] < lens).astype(jnp.int32)              # [B, S]
    bound_attn = 1.0 / (3.0 * H) ** 0.5
    attn_w = jax.random.uniform(k_w, (H, 3 * H), jnp.float32, -bound_attn, bound_attn)
    attn_b = jax.random.uniform(k_b, (H,), jnp.float32, -bound_attn, bound_attn)
    bound_v = 1.0 / float(H) ** 0.5
    v_w = jax.random.uniform(k_v, (1, H), jnp.float32, -bound_v, bound_v)
    return decoder_hide, encoder_out, mask, attn_w, attn_b, v_w


if __name__ == "__main__":
    key = jax.random.PRNGKey(0)
    k1, k2 = jax.random.split(key)

    # ---- small shapes (single tile, grid (1, 1)) ----
    B, S, H = 2, 8, 32
    args = _make_inputs(k1, B, S, H)
    ref = attention_ref(*args)

    out_f32 = attention_pallas(*args, compute_dtype=jnp.float32)          # strict-precision path
    jax.block_until_ready(out_f32)
    assert out_f32.shape == (B, S)
    assert jnp.allclose(out_f32, ref, atol=1e-4, rtol=1e-3), "f32 path mismatch vs reference"
    assert jnp.allclose(jnp.sum(out_f32, axis=1), 1.0, atol=1e-3), "softmax rows must sum to 1"

    out_bf16 = attention_pallas(*args)                                     # default bf16-MXU path
    jax.block_until_ready(out_bf16)
    assert jnp.allclose(out_bf16, ref, atol=2e-2, rtol=2e-2), "bf16 path mismatch vs reference"
    assert jnp.allclose(jnp.sum(out_bf16, axis=1), 1.0, atol=1e-3)

    # ---- larger shapes exercising ragged batch + ragged multi-tile sequence (grid (2, 3)) ----
    B2, S2, H2 = 10, 300, 32
    args2 = _make_inputs(k2, B2, S2, H2)
    ref2 = attention_ref(*args2)
    out2 = attention_pallas(*args2, seq_tile=128)
    jax.block_until_ready(out2)
    assert out2.shape == (B2, S2)
    assert jnp.allclose(out2, ref2, atol=2e-2, rtol=2e-2), "tiled path mismatch vs reference"
    assert jnp.allclose(jnp.sum(out2, axis=1), 1.0, atol=1e-3)

    print("KERNEL_OK")
</pallas_src>

<mosaic_0001>
module attributes {stable_mosaic.version = 11 : i64} {
  func.func @_scores_kernel(%arg0: i32, %arg1: i32, %arg2: memref<2x32xf32, #tpu.memory_space<vmem>>, %arg3: memref<2x8x64xf32, #tpu.memory_space<vmem>>, %arg4: memref<64x32xf32, #tpu.memory_space<vmem>>, %arg5: memref<1x32xf32, #tpu.memory_space<vmem>>, %arg6: memref<2x8xi32, #tpu.memory_space<vmem>>, %arg7: memref<2x8xf32, #tpu.memory_space<vmem>>) attributes {dimension_semantics = [#tpu.dimension_semantics<parallel>, #tpu.dimension_semantics<parallel>], iteration_bounds = array<i64: 1, 1>, scalar_prefetch = 0 : i64, scratch_operands = 0 : i64, tpu.core_type = #tpu.core_type<tc>, window_params = [{transform_indices = @transform_0, window_bounds = array<i64: 2, 32>}, {transform_indices = @transform_1, window_bounds = array<i64: 2, 8, 64>}, {pipeline_mode = #tpu.pipeline_mode<synchronous>, transform_indices = @transform_2, window_bounds = array<i64: 64, 32>}, {pipeline_mode = #tpu.pipeline_mode<synchronous>, transform_indices = @transform_3, window_bounds = array<i64: 1, 32>}, {transform_indices = @transform_4, window_bounds = array<i64: 2, 8>}, {transform_indices = @transform_5, window_bounds = array<i64: 2, 8>}]} {
    %c0 = arith.constant 0 : index
    %c0_0 = arith.constant 0 : index
    %c0_1 = arith.constant 0 : index
    %0 = vector.load %arg3[%c0, %c0_0, %c0_1] : memref<2x8x64xf32, #tpu.memory_space<vmem>>, vector<2x8x64xf32>
    %c0_2 = arith.constant 0 : index
    %c0_3 = arith.constant 0 : index
    %1 = vector.load %arg4[%c0_2, %c0_3] : memref<64x32xf32, #tpu.memory_space<vmem>>, vector<64x32xf32>
    %2 = vector.shape_cast %1 : vector<64x32xf32> to vector<1x64x32xf32>
    %3 = vector.shape_cast %2 : vector<1x64x32xf32> to vector<1x64x32xf32>
    %4 = vector.broadcast %3 : vector<1x64x32xf32> to vector<2x64x32xf32>
    "tpu.trace_start"() <{level = 10 : i32, message = "bsf,bfh->bsh"}> : () -> ()
    %cst = arith.constant dense<0.000000e+00> : vector<2x8x32xf32>
    %5 = tpu.matmul %0, %4, %cst {dimension_numbers = #tpu.dot_dimension_numbers<[2], [1], [1], [2], [0, 0, 0, 1, 1, 2], [0], [0]>} : vector<2x8x64xf32>, vector<2x64x32xf32>, vector<2x8x32xf32> -> vector<2x8x32xf32>
    "tpu.trace_stop"() : () -> ()
    %c0_4 = arith.constant 0 : index
    %c0_5 = arith.constant 0 : index
    %6 = vector.load %arg2[%c0_4, %c0_5] : memref<2x32xf32, #tpu.memory_space<vmem>>, vector<2x32xf32>
    %7 = vector.shape_cast %6 : vector<2x32xf32> to vector<2x1x32xf32>
    %8 = vector.broadcast %7 : vector<2x1x32xf32> to vector<2x8x32xf32>
    %9 = arith.addf %5, %8 : vector<2x8x32xf32>
    %10 = math.tanh %9 : vector<2x8x32xf32>
    %c0_6 = arith.constant 0 : index
    %c0_7 = arith.constant 0 : index
    %11 = vector.load %arg5[%c0_6, %c0_7] : memref<1x32xf32, #tpu.memory_space<vmem>>, vector<1x32xf32>
    %12 = vector.shape_cast %11 : vector<1x32xf32> to vector<1x1x32xf32>
    %13 = vector.broadcast %12 : vector<1x1x32xf32> to vector<2x8x32xf32>
    %14 = arith.mulf %10, %13 : vector<2x8x32xf32>
    %cst_8 = arith.constant dense<0.000000e+00> : vector<2x8xf32>
    %15 = vector.multi_reduction <add>, %14, %cst_8 [2] : vector<2x8x32xf32> to vector<2x8xf32>
    %c0_9 = arith.constant 0 : index
    %c0_10 = arith.constant 0 : index
    %16 = vector.load %arg6[%c0_9, %c0_10] : memref<2x8xi32, #tpu.memory_space<vmem>>, vector<2x8xi32>
    %c0_i32 = arith.constant 0 : i32
    %17 = vector.broadcast %c0_i32 : i32 to vector<2x8xi32>
    %18 = arith.cmpi eq, %16, %17 : vector<2x8xi32>
    %cst_11 = arith.constant -1.000000e+05 : f32
    %19 = vector.broadcast %cst_11 : f32 to vector<2x8xf32>
    %20 = arith.select %18, %19, %15 : vector<2x8xi1>, vector<2x8xf32>
    %c0_12 = arith.constant 0 : index
    %c0_13 = arith.constant 0 : index
    %21 = vector.load %arg7[%c0_12, %c0_13] : memref<2x8xf32, #tpu.memory_space<vmem>>, vector<2x8xf32>
    tpu.vector_store %arg7[%c0_12, %c0_13], %20 {strides = array<i32>} : memref<2x8xf32, #tpu.memory_space<vmem>>, vector<2x8xf32>,
    return
  }
  func.func @transform_0(%arg0: i32, %arg1: i32) -> (i32, i32) {
    %c0_i32 = arith.constant 0 : i32
    %c0_i32_0 = arith.constant 0 : i32
    return %arg0, %c0_i32 : i32, i32
  }
  func.func @transform_1(%arg0: i32, %arg1: i32) -> (i32, i32, i32) {
    %c0_i32 = arith.constant 0 : i32
    %c0_i32_0 = arith.constant 0 : i32
    return %arg0, %arg1, %c0_i32 : i32, i32, i32
  }
  func.func @transform_2(%arg0: i32, %arg1: i32) -> (i32, i32) {
    %c0_i32 = arith.constant 0 : i32
    %c0_i32_0 = arith.constant 0 : i32
    %c0_i32_1 = arith.constant 0 : i32
    return %c0_i32, %c0_i32_0 : i32, i32
  }
  func.func @transform_3(%arg0: i32, %arg1: i32) -> (i32, i32) {
    %c0_i32 = arith.constant 0 : i32
    %c0_i32_0 = arith.constant 0 : i32
    %c0_i32_1 = arith.constant 0 : i32
    return %c0_i32, %c0_i32_0 : i32, i32
  }
  func.func @transform_4(%arg0: i32, %arg1: i32) -> (i32, i32) {
    %c0_i32 = arith.constant 0 : i32
    return %arg0, %arg1 : i32, i32
  }
  func.func @transform_5(%arg0: i32, %arg1: i32) -> (i32, i32) {
    %c0_i32 = arith.constant 0 : i32
    return %arg0, %arg1 : i32, i32
  }
}

</mosaic_0001>

<bundles_post_ra>
// kernel: tpu_custom_call.1
= control target key start
LH: loop header
LB: loop body
LE: loop exit
PB: predicated region body
PF: predicated region fallthrough
CT: control target
= control target key end

     0   :  { %s237_s0 = inlined_call_operand.vmem [shape: f32[2,32], index: 0, kind: input, shape index: {}]   ;;  %s238_s1 = inlined_call_operand.vmem [shape: f32[2,8,64], index: 1, kind: input, shape index: {}]   ;;  %s239_s2 = inlined_call_operand.vmem [shape: f32[64,32], index: 2, kind: input, shape index: {}]   ;;  %s240_s3 = inlined_call_operand.vmem [shape: f32[1,32], index: 3, kind: input, shape index: {}]   ;;  %s241_s4 = inlined_call_operand.vmem [shape: s32[2,8], index: 4, kind: input, shape index: {}]   ;;  %s242_s5 = inlined_call_operand.hbm [shape: f32[2,8], index: 5, kind: output, shape index: {}]  }
   0x1   :  { %v30_v0 = vld [vmem:[%s239_s2 + $0x38] sm:$0xff]  ;;  %v29_v1 = vld [vmem:[%s239_s2 + $0x30] sm:$0xff]  ;;  %v28_v2 = vld [vmem:[%s239_s2 + $0x28] sm:$0xff] }
   0x2   :  { %50 = vmatpush.msra.mxu0 %v30_v0  ;;  %73 = vmatpush.msra.mxu1 %v30_v0  ;;  %v27_v3 = vld [vmem:[%s239_s2 + $0x20] sm:$0xff] }
   0x4   :  { %51 = vmatpush.msra.mxu0 %v29_v1  ;;  %74 = vmatpush.msra.mxu1 %v29_v1 }
   0x5   :  { %10 = vsyncpa [#allocation3], 0  ;;  %v26_v4 = vld [vmem:[%s239_s2 + $0x18] sm:$0xff]  ;;  %v25_v5 = vld [vmem:[%s239_s2 + $0x10] sm:$0xff]  ;;  %vm38_vm0 = vcmask 523264   ;;  %vm93_vm1 = vcmask 261120   ;;  %v104_v26 = vlaneseq }
   0x6   :  { %52 = vmatpush.msra.mxu0 %v28_v2  ;;  %75 = vmatpush.msra.mxu1 %v28_v2  ;;  %v24_v6 = vld [vmem:[%s239_s2 + $0x8] sm:$0xff]  ;;  %v23_v7 = vld [vmem:[%s239_s2] sm:$0xff]  ;;  %vm108_vm2 = vcmask 1041409   ;;  %s164_s16 = smov [#allocation2]   ;;  %s121_s19 = sshll.u32 %s242_s5, 4  ;;  %vm112_vm4 = vcmask 58368   ;;  %s122_s19 = int_to_ptr.hbm [resolvable:$true] %s121_s19 }
   0x7   :  { %v21_v8 = vld [vmem:[%s238_s1] sm:$0xff]  ;;  %v22_v9 = vld [vmem:[%s238_s1 + $0x8] sm:$0xff]  ;;  %v105_v27 = vand.u32 127, %v104_v26 }
   0x8   :  { %53 = vmatpush.msra.mxu0 %v27_v3  ;;  %76 = vmatpush.msra.mxu1 %v27_v3  ;;  %v31_v10 = vld [vmem:[%s237_s0] sm:$0x3] }
   0x9   :  { %v33_v11 = vrot.slane %v31_v10, 1  ;;  %v34_v12 = vperm.slane %v31_v10, 0  ;;  %v133_v18 = vld [vmem:[%s240_s3] ss:$0 sm:$0xff]  ;;  %s119_s3 = sshll.u32 %s164_s16, 4  ;;  %s120_s3 = int_to_ptr.vmem [resolvable:$true] %s119_s3 }
   0xa   :  { %54 = vmatpush.msra.mxu0 %v26_v4  ;;  %77 = vmatpush.msra.mxu1 %v26_v4  ;;  %v100_v28 = vld [vmem:[%s241_s4] sm:$0x3] }
   0xb   :  { %v35_v13 = vperm.slane %v33_v11, 0  ;;  %vm101_vm3 = vcmp.eq.s32.totalorder %v100_v28, 0 }
   0xc   :  { %55 = vmatpush.msra.mxu0 %v25_v5  ;;  %78 = vmatpush.msra.mxu1 %v25_v5 }
   0xe   :  { %56 = vmatpush.msra.mxu0 %v24_v6  ;;  %79 = vmatpush.msra.mxu1 %v24_v6 }
  0x10   :  { %57 = vmatpush.msra.mxu0 %v23_v7  ;;  %80 = vmatpush.msra.mxu1 %v23_v7 }
  0x11   :  { %130 = vmatmul.msk.f32.vlgmr.msra.gmra.mxu0 %vm38_vm0, %v21_v8  ;;  %131 = vmatmul.msk.f32.vlgmr.msra.gmra.mxu1 %vm38_vm0, %v22_v9 }
  0x8e   :  { %v59_v14 = vpop.f32.mrf.mxu0  ;;  %v82_v15 = vpop.f32.mrf.mxu1 }
  0x8f   :  { %v60_v16 = vadd.f32 %v59_v14, %v34_v12  ;;  %v83_v17 = vadd.f32 %v82_v15, %v35_v13 }
  0x91   :  { %134 = vtanh.f32 %v60_v16 }
  0x92   :  { %136 = vtanh.f32 %v83_v17 }
  0x97   :  { %v135_v19 = vpop.eup %134 }
  0x98   :  { %v91_v20 = vmul.f32 %v135_v19, %v133_v18  ;;  %v137_v21 = vpop.eup %136 }
  0x99   :  { %v92_v23 = vmul.f32 %v137_v21, %v133_v18 }
  0x9a   :  { %v94_v22 = vsel %vm93_vm1, %v91_v20, 0.0 }
  0x9b   :  { %95 = vadd.xlane.f32.xlu0 %v94_v22  ;;  %v97_v24 = vsel %vm93_vm1, %v92_v23, 0.0 }
  0xa3   :  { %98 = vadd.xlane.f32.xlu0 %v97_v24 }
 0x10e   :  { %v96_v25 = vpop.xlane.xlu0 %95 }
 0x10f   :  { %v106_v30 = vperm.slane %v96_v25, %v105_v27 }
 0x116   :  { %v99_v29 = vpop.xlane.xlu0 %98 }
 0x117   :  { %v107_v31 = vperm.slane %v99_v29, %v105_v27 }
 0x119   :  { %v109_v32 = vsel %vm108_vm2, %v107_v31, %v106_v30 }
 0x11a   :  { %v111_v33 = vsel %vm101_vm3, -100000.0, %v109_v32 }
 0x11b   :  { %113 = vst.msk [vmem:[#allocation2] sm:$0x3] %vm112_vm4, %v111_v33 }
 0x11c   :  { %124 = dma.vmem_to_hbm [thread:$0]  %s120_s3, 32, %s122_s19, [#allocation3]  }
 0x11d   :  { %162 = dma.done.wait [#allocation3], 32  }
 0x11e   :  { %163 = vsyncadd [#allocation3], 4294967264 }
 0x11f   :  { %129 = vsyncpa [#allocation3], 1 }

</bundles_post_ra>
